<compile_context>
chip_gen: v7x
topology: tpu7x:2x2x1
jax: 0.10.0
libtpu: 0.0.40
codegen_flags: <defaults>
</compile_context>

<pallas_src>
from functools import partial

import numpy as np
import jax
import jax.numpy as jnp
from jax.experimental import pallas as pl
from jax.experimental.pallas import tpu as pltpu


def _round_up(x, m):
    return ((x + m - 1) // m) * m


def _cdiv(a, b):
    return -(-a // b)


def _device_vmem_limit_bytes():
    """Generation-aware VMEM limit: physical capacity minus headroom."""
    try:
        cap = int(pltpu.get_tpu_info().vmem_capacity_bytes)
    except Exception:
        cap = 64 * 1024 * 1024  # conservative fallback (v7x per-TC VMEM)
    headroom = max(8 * 1024 * 1024, cap // 8)
    return max(32 * 1024 * 1024, cap - headroom)


def _select_tiling(d, out_pad, w_itemsize, budget_bytes):
    """Pick (d_pad, tile_n, tile_k) from a VMEM budget.

    Budgets conservatively assume f32 activations / f32 outputs.
    tile_k is None when the whole fused weight stays resident in VMEM.
    """
    x_item, out_item = 4, 4
    b_bytes = out_pad * 4

    # Path 1: whole weight resident (single-buffered, constant index_map).
    d_pad = d if d % 128 == 0 else _round_up(d, 128)
    w_bytes = d_pad * out_pad * w_itemsize
    if w_bytes <= 0.6 * budget_bytes:
        avail = budget_bytes - w_bytes - b_bytes
        per_row = 2 * d_pad * x_item + 2 * out_pad * out_item
        tile_n = int(avail // max(1, per_row))
        tile_n = max(16, min(1024, (tile_n // 16) * 16))
        return d_pad, tile_n, None

    # Path 2: stream K-slabs of the weight (double-buffered).
    d_pad0 = _round_up(d, 128)
    slab_budget = int(0.4 * budget_bytes)
    tile_k = slab_budget // max(1, 2 * out_pad * w_itemsize)
    tile_k = max(128, (tile_k // 128) * 128)
    n_k = _cdiv(d_pad0, tile_k)
    tile_k = _round_up(_cdiv(d_pad0, n_k), 128)   # rebalance K-slabs evenly
    d_pad = tile_k * n_k
    w_slab_bytes = 2 * tile_k * out_pad * w_itemsize
    avail = budget_bytes - w_slab_bytes - b_bytes
    per_row = 2 * tile_k * x_item + 2 * out_pad * out_item + out_pad * 4  # +acc
    tile_n = int(avail // max(1, per_row))
    tile_n = max(16, min(1024, (tile_n // 16) * 16))
    return d_pad, tile_n, tile_k


# ---------------------------------------------------------------------------
# Kernels
# ---------------------------------------------------------------------------

def _fused_linear_kernel(x_ref, w_ref, b_ref, o_ref):
    """One row-tile: o = x @ W + b. Weight fully resident in VMEM."""
    x = x_ref[...].astype(w_ref.dtype)                       # in-kernel cast
    acc = jnp.dot(x, w_ref[...], preferred_element_type=jnp.float32)
    o_ref[...] = (acc + b_ref[...]).astype(o_ref.dtype)


def _fused_linear_ktiled_kernel(x_ref, w_ref, b_ref, o_ref, acc_ref):
    """Row-tile x K-slab: accumulate x @ W over the K grid axis."""
    k = pl.program_id(1)

    @pl.when(k == 0)
    def _():
        acc_ref[...] = jnp.zeros_like(acc_ref)

    x = x_ref[...].astype(w_ref.dtype)
    acc_ref[...] += jnp.dot(x, w_ref[...], preferred_element_type=jnp.float32)

    @pl.when(k == pl.num_programs(1) - 1)
    def _():
        o_ref[...] = (acc_ref[...] + b_ref[...]).astype(o_ref.dtype)


# ---------------------------------------------------------------------------
# Jitted wrappers (pad-if-needed + pallas_call + head split, one dispatch)
# ---------------------------------------------------------------------------

@partial(jax.jit, static_argnames=("tile_n", "cls_out", "box_out", "vmem_limit"))
def _forward_resident(x, w, b, *, tile_n, cls_out, box_out, vmem_limit):
    if x.ndim > 2:
        x = x.reshape(x.shape[0], -1)
    n, d = x.shape
    d_pad, out_pad = w.shape
    if d_pad != d:                                   # only when D % 128 != 0
        x = jnp.pad(x, ((0, 0), (0, d_pad - d)))

    grid_n = _cdiv(n, tile_n)                        # partial last block OK
    out = pl.pallas_call(
        _fused_linear_kernel,
        out_shape=jax.ShapeDtypeStruct((n, out_pad), x.dtype),
        grid=(grid_n,),
        in_specs=[
            pl.BlockSpec((tile_n, d_pad), lambda i: (i, 0)),          # x stream
            pl.BlockSpec((d_pad, out_pad), lambda i: (0, 0),
                         pipeline_mode=pl.Buffered(1)),               # resident W
            pl.BlockSpec((1, out_pad), lambda i: (0, 0),
                         pipeline_mode=pl.Buffered(1)),               # resident b
        ],
        out_specs=pl.BlockSpec((tile_n, out_pad), lambda i: (i, 0)),
        compiler_params=pltpu.CompilerParams(
            dimension_semantics=("parallel",),
            vmem_limit_bytes=int(vmem_limit),
        ),
    )(x, w, b)

    scores = out[:, :cls_out] if cls_out else None
    deltas = out[:, cls_out:cls_out + box_out] if box_out else None
    return scores, deltas


@partial(jax.jit,
         static_argnames=("tile_n", "tile_k", "cls_out", "box_out", "vmem_limit"))
def _forward_ktiled(x, w, b, *, tile_n, tile_k, cls_out, box_out, vmem_limit):
    if x.ndim > 2:
        x = x.reshape(x.shape[0], -1)
    n, d = x.shape
    d_pad, out_pad = w.shape
    if d_pad != d:
        x = jnp.pad(x, ((0, 0), (0, d_pad - d)))     # zero-pad reduction dim

    grid = (_cdiv(n, tile_n), d_pad // tile_k)
    out = pl.pallas_call(
        _fused_linear_ktiled_kernel,
        out_shape=jax.ShapeDtypeStruct((n, out_pad), x.dtype),
        grid=grid,
        in_specs=[
            pl.BlockSpec((tile_n, tile_k), lambda i, k: (i, k)),
            pl.BlockSpec((tile_k, out_pad), lambda i, k: (k, 0)),
            pl.BlockSpec((1, out_pad), lambda i, k: (0, 0),
                         pipeline_mode=pl.Buffered(1)),
        ],
        out_specs=pl.BlockSpec((tile_n, out_pad), lambda i, k: (i, 0)),
        scratch_shapes=[pltpu.VMEM((tile_n, out_pad), jnp.float32)],
        compiler_params=pltpu.CompilerParams(
            dimension_semantics=("parallel", "arbitrary"),
            vmem_limit_bytes=int(vmem_limit),
        ),
    )(x, w, b)

    scores = out[:, :cls_out] if cls_out else None
    deltas = out[:, cls_out:cls_out + box_out] if box_out else None
    return scores, deltas


# ---------------------------------------------------------------------------
# Module
# ---------------------------------------------------------------------------

class FastRCNNOutputLayersPallas:
    """JAX/Pallas re-implementation of FastRCNNOutputLayers (forward only)."""

    def __init__(self, input_size, num_classes, cls_agnostic_bbox_reg,
                 box_dim=4, class_refine=True, box_refine=True, seed=0,
                 weight_dtype=jnp.bfloat16, vmem_budget_bytes=None):
        self.class_refine = class_refine
        self.box_refine = box_refine
        if not isinstance(input_size, int):
            input_size = int(np.prod(input_size))
        self.input_size = input_size

        key = jax.random.PRNGKey(seed)
        k_cls, k_box = jax.random.split(key, 2)

        self.cls_out = 0
        self.box_out = 0
        blocks_w, blocks_b = [], []

        if self.class_refine:
            # nn.Linear(input_size, num_classes + 1), weight ~ N(0, 0.01), bias 0
            self.cls_out = num_classes + 1
            self.cls_w = (0.01 * jax.random.normal(
                k_cls, (self.cls_out, input_size))).astype(jnp.float32)
            self.cls_b = jnp.zeros((self.cls_out,), jnp.float32)
            blocks_w.append(self.cls_w)
            blocks_b.append(self.cls_b)

        if self.box_refine:
            num_bbox_reg_classes = 1 if cls_agnostic_bbox_reg else num_classes
            self.box_out = num_bbox_reg_classes * box_dim
            # nn.Linear(input_size, num_bbox_reg_classes * box_dim), std=0.001
            self.box_w = (0.001 * jax.random.normal(
                k_box, (self.box_out, input_size))).astype(jnp.float32)
            self.box_b = jnp.zeros((self.box_out,), jnp.float32)
            blocks_w.append(self.box_w)
            blocks_b.append(self.box_b)

        out_total = self.cls_out + self.box_out
        if out_total == 0:
            self._w_fused = None
            self._b_fused = None
            return

        # --- fuse heads, pad OUT to 128 lanes; all layout work done once ----
        self.out_pad = _round_up(out_total, 128)
        w_itemsize = jnp.dtype(weight_dtype).itemsize

        self.vmem_limit = _device_vmem_limit_bytes()
        budget = min(vmem_budget_bytes, self.vmem_limit) \
            if vmem_budget_bytes else self.vmem_limit
        self.d_pad, self.tile_n, self.tile_k = _select_tiling(
            input_size, self.out_pad, w_itemsize, budget)

        w = jnp.concatenate(blocks_w, axis=0).T               # (D, out_total)
        w = jnp.pad(w, ((0, self.d_pad - input_size),
                        (0, self.out_pad - out_total)))
        b = jnp.concatenate(blocks_b).reshape(1, -1)
        b = jnp.pad(b, ((0, 0), (0, self.out_pad - out_total)))
        self._w_fused = w.astype(weight_dtype)                # bf16 by default
        self._b_fused = b.astype(jnp.float32)                 # f32 bias add

    def __call__(self, x):
        if self._w_fused is None:
            # Original module would reference undefined names; keep (None, None).
            return None, None

        if x.ndim > 2:
            x = x.reshape(x.shape[0], -1)
        n, d = x.shape
        assert d == self.input_size, (d, self.input_size)

        # Cap the row tile at ~N/2 so the "parallel" axis has >=2 grid steps
        # (uses both v7x TensorCores); shape-derived, so no extra recompiles.
        eff_tile_n = min(self.tile_n, max(16, _round_up(_cdiv(n, 2), 16)))

        if self.tile_k is None:
            return _forward_resident(
                x, self._w_fused, self._b_fused,
                tile_n=eff_tile_n, cls_out=self.cls_out, box_out=self.box_out,
                vmem_limit=self.vmem_limit)
        return _forward_ktiled(
            x, self._w_fused, self._b_fused,
            tile_n=eff_tile_n, tile_k=self.tile_k,
            cls_out=self.cls_out, box_out=self.box_out,
            vmem_limit=self.vmem_limit)


# ---------------------------------------------------------------------------
# Self-test
# ---------------------------------------------------------------------------

if __name__ == "__main__":
    # Small ROI-feature shapes consistent with the module: (N, C, H, W).
    N, C, H, W = 16, 4, 8, 8          # input_size = 4*8*8 = 256
    num_classes = 8
    box_dim = 4
    cls_agnostic = False              # bbox out = num_classes * box_dim = 32

    key = jax.random.PRNGKey(0)
    x = jax.random.normal(key, (N, C, H, W), dtype=jnp.float32)
    xf = x.reshape(N, -1)

    # --- exact path (f32 weights), both heads --------------------------------
    layer_f32 = FastRCNNOutputLayersPallas(
        input_size=(C, H, W), num_classes=num_classes,
        cls_agnostic_bbox_reg=cls_agnostic, box_dim=box_dim,
        class_refine=True, box_refine=True, seed=0,
        weight_dtype=jnp.float32)

    scores, deltas = layer_f32(x)
    jax.block_until_ready((scores, deltas))

    ref_scores = xf @ layer_f32.cls_w.T + layer_f32.cls_b
    ref_deltas = xf @ layer_f32.box_w.T + layer_f32.box_b
    assert scores.shape == (N, num_classes + 1)
    assert deltas.shape == (N, num_classes * box_dim)
    assert jnp.allclose(scores, ref_scores, atol=1e-4, rtol=1e-4)
    assert jnp.allclose(deltas, ref_deltas, atol=1e-4, rtol=1e-4)

    # --- partial last row-block (N not a multiple of the tile) ---------------
    n_odd = 13
    s_odd, d_odd = layer_f32(x[:n_odd])
    jax.block_until_ready((s_odd, d_odd))
    assert s_odd.shape == (n_odd, num_classes + 1)
    assert jnp.allclose(s_odd, ref_scores[:n_odd], atol=1e-4, rtol=1e-4)
    assert jnp.allclose(d_odd, ref_deltas[:n_odd], atol=1e-4, rtol=1e-4)

    # --- default bf16-weight path (VMEM-friendly production default) ---------
    layer_bf16 = FastRCNNOutputLayersPallas(
        input_size=(C, H, W), num_classes=num_classes,
        cls_agnostic_bbox_reg=cls_agnostic, box_dim=box_dim,
        class_refine=True, box_refine=True, seed=0)
    s_bf, d_bf = layer_bf16(x)
    jax.block_until_ready((s_bf, d_bf))
    assert jnp.allclose(s_bf, ref_scores, atol=3e-2, rtol=3e-2)
    assert jnp.allclose(d_bf, ref_deltas, atol=3e-2, rtol=3e-2)

    # --- degenerate config (cls head only) -----------------------------------
    layer_cls = FastRCNNOutputLayersPallas(
        input_size=(C, H, W), num_classes=num_classes,
        cls_agnostic_bbox_reg=cls_agnostic, box_dim=box_dim,
        class_refine=True, box_refine=False, seed=0,
        weight_dtype=jnp.float32)
    s2, d2 = layer_cls(x)
    jax.block_until_ready(s2)
    assert d2 is None
    assert jnp.allclose(s2, xf @ layer_cls.cls_w.T + layer_cls.cls_b,
                        atol=1e-4, rtol=1e-4)

    # --- K-tiled path (forced via a tiny tiling budget; for huge input_size) -
    layer_kt = FastRCNNOutputLayersPallas(
        input_size=(C, H, W), num_classes=num_classes,
        cls_agnostic_bbox_reg=cls_agnostic, box_dim=box_dim,
        class_refine=True, box_refine=True, seed=0,
        weight_dtype=jnp.float32, vmem_budget_bytes=150 * 1024)
    assert layer_kt.tile_k is not None            # K-streaming path engaged
    s_kt, d_kt = layer_kt(x)
    jax.block_until_ready((s_kt, d_kt))
    assert jnp.allclose(s_kt, ref_scores, atol=1e-4, rtol=1e-4)
    assert jnp.allclose(d_kt, ref_deltas, atol=1e-4, rtol=1e-4)

    print("KERNEL_OK")
</pallas_src>

<mosaic_0001>
module attributes {stable_mosaic.version = 11 : i64} {
  func.func @_fused_linear_kernel(%arg0: i32, %arg1: memref<16x256xf32, #tpu.memory_space<vmem>>, %arg2: memref<256x128xf32, #tpu.memory_space<vmem>>, %arg3: memref<1x128xf32, #tpu.memory_space<vmem>>, %arg4: memref<16x128xf32, #tpu.memory_space<vmem>>) attributes {dimension_semantics = [#tpu.dimension_semantics<parallel>], iteration_bounds = array<i64: 1>, scalar_prefetch = 0 : i64, scratch_operands = 0 : i64, tpu.core_type = #tpu.core_type<tc>, window_params = [{transform_indices = @transform_0, window_bounds = array<i64: 16, 256>}, {pipeline_mode = #tpu.pipeline_mode<synchronous>, transform_indices = @transform_1, window_bounds = array<i64: 256, 128>}, {pipeline_mode = #tpu.pipeline_mode<synchronous>, transform_indices = @transform_2, window_bounds = array<i64: 1, 128>}, {transform_indices = @transform_3, window_bounds = array<i64: 16, 128>}]} {
    %c0 = arith.constant 0 : index
    %c0_0 = arith.constant 0 : index
    %0 = vector.load %arg1[%c0, %c0_0] : memref<16x256xf32, #tpu.memory_space<vmem>>, vector<16x256xf32>
    %c0_1 = arith.constant 0 : index
    %c0_2 = arith.constant 0 : index
    %1 = vector.load %arg2[%c0_1, %c0_2] : memref<256x128xf32, #tpu.memory_space<vmem>>, vector<256x128xf32>
    %cst = arith.constant dense<0.000000e+00> : vector<16x128xf32>
    %2 = tpu.matmul %0, %1, %cst {dimension_numbers = #tpu.dot_dimension_numbers<[1], [0], [0], [1], [0, 0, 1, 1], [], []>} : vector<16x256xf32>, vector<256x128xf32>, vector<16x128xf32> -> vector<16x128xf32>
    %c0_3 = arith.constant 0 : index
    %c0_4 = arith.constant 0 : index
    %3 = vector.load %arg3[%c0_3, %c0_4] : memref<1x128xf32, #tpu.memory_space<vmem>>, vector<1x128xf32>
    %4 = vector.broadcast %3 : vector<1x128xf32> to vector<16x128xf32>
    %5 = arith.addf %2, %4 : vector<16x128xf32>
    %c0_5 = arith.constant 0 : index
    %c0_6 = arith.constant 0 : index
    %6 = vector.load %arg4[%c0_5, %c0_6] : memref<16x128xf32, #tpu.memory_space<vmem>>, vector<16x128xf32>
    tpu.vector_store %arg4[%c0_5, %c0_6], %5 {strides = array<i32>} : memref<16x128xf32, #tpu.memory_space<vmem>>, vector<16x128xf32>,
    return
  }
  func.func @transform_0(%arg0: i32) -> (i32, i32) {
    %c0_i32 = arith.constant 0 : i32
    %c0_i32_0 = arith.constant 0 : i32
    return %arg0, %c0_i32 : i32, i32
  }
  func.func @transform_1(%arg0: i32) -> (i32, i32) {
    %c0_i32 = arith.constant 0 : i32
    %c0_i32_0 = arith.constant 0 : i32
    %c0_i32_1 = arith.constant 0 : i32
    return %c0_i32, %c0_i32_0 : i32, i32
  }
  func.func @transform_2(%arg0: i32) -> (i32, i32) {
    %c0_i32 = arith.constant 0 : i32
    %c0_i32_0 = arith.constant 0 : i32
    %c0_i32_1 = arith.constant 0 : i32
    return %c0_i32, %c0_i32_0 : i32, i32
  }
  func.func @transform_3(%arg0: i32) -> (i32, i32) {
    %c0_i32 = arith.constant 0 : i32
    %c0_i32_0 = arith.constant 0 : i32
    return %arg0, %c0_i32 : i32, i32
  }
}

</mosaic_0001>

<bundles_post_ra>
// kernel: _forward_resident.1
= control target key start
LH: loop header
LB: loop body
LE: loop exit
PB: predicated region body
PF: predicated region fallthrough
CT: control target
= control target key end

     0   :  { %8 = vsyncpa [#allocation3], 0  ;;  %s368_s0 = inlined_call_operand.hbm [shape: f32[16,256], index: 0, kind: input, shape index: {}]   ;;  %s369_s1 = inlined_call_operand.hbm [shape: f32[256,128], index: 1, kind: input, shape index: {}]   ;;  %s370_s2 = inlined_call_operand.vmem [shape: f32[1,128], index: 2, kind: input, shape index: {}]   ;;  %s371_s3 = inlined_call_operand.vmem [shape: f32[16,128], index: 3, kind: output, shape index: {}]  }
   0x1   :  { %9 = vsyncpa [#allocation5], 0  ;;  %s309_s12 = smov [#allocation2]   ;;  %s261_s16 = scalar_lea.hbm %s368_s0, 512 }
   0x2   :  { %s15_s13 = sshll.u32 %s309_s12, 4  ;;  %p262_p0 = scmp.ne.s32.totalorder %s368_s0, %s261_s16  ;;  %s16_s13 = int_to_ptr.vmem [resolvable:$true] %s15_s13 }
   0x3   :  { %p265_p1 = scmp.lt.u32.totalorder %s261_s16, %s368_s0 }
   0x5   :  { %p267_p2 = pnand %p265_p1, %p262_p0 }
   0x7   :  { %270 = shalt.err (!%p267_p2)
}
   0x8   :  { %s271_s21 = scalar_lea.vmem %s16_s13, 512  ;;  %p276_p4 = scmp.lt.s32.totalorder %s16_s13, %s16_s13 }
   0x9   :  { %p272_p3 = scmp.ne.s32.totalorder %s16_s13, %s271_s21  ;;  %p277_p5 = scmp.lt.s32.totalorder %s271_s21, %s271_s21 }
   0xb   :  { %p278_p6 = por %p277_p5, %p276_p4 }
   0xd   :  { %p279_p7 = pnand %p278_p6, %p272_p3 }
   0xf   :  { %282 = shalt.err (!%p279_p7)
}
  0x10   :  { %s310_s22 = smov 256   ;;  %s311_s23 = smov 16  }
  0x11   :  { %21 = dma.hbm_to_vmem [thread:$0]  %s368_s0, 512, %s16_s13, [#allocation3], %s310_s22, %s310_s22, %s311_s23  }
  0x12   :  { %s312_s26 = smov [#allocation4]   ;;  %s283_s30 = scalar_lea.hbm %s369_s1, 4096 }
  0x13   :  { %s27_s27 = sshll.u32 %s312_s26, 4  ;;  %p284_p8 = scmp.ne.s32.totalorder %s369_s1, %s283_s30  ;;  %s28_s27 = int_to_ptr.vmem [resolvable:$true] %s27_s27 }
  0x14   :  { %p287_p9 = scmp.lt.u32.totalorder %s283_s30, %s369_s1 }
  0x16   :  { %p289_p10 = pnand %p287_p9, %p284_p8 }
  0x18   :  { %292 = shalt.err (!%p289_p10)
}
  0x19   :  { %s293_s8 = scalar_lea.vmem %s28_s27, 4096  ;;  %p298_p12 = scmp.lt.s32.totalorder %s28_s27, %s28_s27 }
  0x1a   :  { %p294_p11 = scmp.ne.s32.totalorder %s28_s27, %s293_s8  ;;  %p299_p13 = scmp.lt.s32.totalorder %s293_s8, %s293_s8 }
  0x1c   :  { %p300_p0 = por %p299_p13, %p298_p12 }
  0x1e   :  { %p301_p1 = pnand %p300_p0, %p294_p11 }
  0x20   :  { %304 = shalt.err (!%p301_p1)
}
  0x21   :  { %s313_s0 = smov 128   ;;  %s314_s9 = smov 8  }
  0x22   :  { %33 = dma.hbm_to_vmem [thread:$0]  %s369_s1, 4096, %s28_s27, [#allocation5], %s313_s0, %s313_s0, %s314_s9  }
  0x23   :  { %305 = dma.done.wait [#allocation3], 512  }
  0x24   :  { %306 = vsyncadd [#allocation3], 4294966784 }
  0x25   :  { %307 = dma.done.wait [#allocation5], 4096  }
  0x26   :  { %308 = vsyncadd [#allocation5], 4294963200  ;;  %v62_v0 = vld [vmem:[#allocation4 + $0x80] sm:$0xff]  ;;  %v63_v1 = vld [vmem:[#allocation4 + $0x88] sm:$0xff] }
  0x27   :  { %v46_v2 = vld [vmem:[#allocation4] sm:$0xff]  ;;  %v207_v3 = vpack.c.bf16 %v63_v1, %v62_v0  ;;  %v47_v4 = vld [vmem:[#allocation4 + $0x8] sm:$0xff]  ;;  %v64_v5 = vld [vmem:[#allocation4 + $0x90] sm:$0xff] }
  0x28   :  { %v65_v6 = vld [vmem:[#allocation4 + $0x98] sm:$0xff]  ;;  %v209_v7 = vpack.c.bf16 %v47_v4, %v46_v2  ;;  %v48_v9 = vld [vmem:[#allocation4 + $0x10] sm:$0xff]  ;;  %v66_v11 = vld [vmem:[#allocation4 + $0xa0] sm:$0xff] }
  0x29   :  { %v211_v8 = vpack.c.bf16 %v65_v6, %v64_v5  ;;  %v49_v10 = vld [vmem:[#allocation4 + $0x18] sm:$0xff]  ;;  %208 = vmatprep.subr.bf16.mxu0 %v207_v3  ;;  %239 = vmatprep.subr.bf16.mxu1 %v207_v3  ;;  %v67_v12 = vld [vmem:[#allocation4 + $0xa8] sm:$0xff]  ;;  %v50_v15 = vld [vmem:[#allocation4 + $0x20] sm:$0xff] }
  0x2a   :  { %210 = vmatpush3.bf16.msra.mxu0 %v209_v7  ;;  %247 = vmatpush3.bf16.msra.mxu1 %v209_v7  ;;  %v213_v13 = vpack.c.bf16 %v49_v10, %v48_v9  ;;  %v215_v14 = vpack.c.bf16 %v67_v12, %v66_v11  ;;  %v51_v16 = vld [vmem:[#allocation4 + $0x28] sm:$0xff]  ;;  %v68_v17 = vld [vmem:[#allocation4 + $0xb0] sm:$0xff]  ;;  %v69_v18 = vld [vmem:[#allocation4 + $0xb8] sm:$0xff] }
  0x2b   :  { %212 = vmatprep.subr.bf16.mxu0 %v211_v8  ;;  %240 = vmatprep.subr.bf16.mxu1 %v211_v8  ;;  %v217_v19 = vpack.c.bf16 %v51_v16, %v50_v15  ;;  %v219_v20 = vpack.c.bf16 %v69_v18, %v68_v17  ;;  %v52_v21 = vld [vmem:[#allocation4 + $0x30] sm:$0xff]  ;;  %v53_v22 = vld [vmem:[#allocation4 + $0x38] sm:$0xff]  ;;  %v70_v23 = vld [vmem:[#allocation4 + $0xc0] sm:$0xff] }
  0x2c   :  { %v71_v24 = vld [vmem:[#allocation4 + $0xc8] sm:$0xff]  ;;  %v45_v26 = vld [vmem:[#allocation2 + $0x18] sm:$0xff]  ;;  %v221_v27 = vpack.c.bf16 %v53_v22, %v52_v21  ;;  %v54_v29 = vld [vmem:[#allocation4 + $0x40] sm:$0xff] }
  0x2d   :  { %v43_v25 = vld [vmem:[#allocation2 + $0x8] sm:$0xff]  ;;  %v223_v28 = vpack.c.bf16 %v71_v24, %v70_v23  ;;  %v72_v31 = vld [vmem:[#allocation4 + $0xd0] sm:$0xff]  ;;  %v73_v32 = vld [vmem:[#allocation4 + $0xd8] sm:$0xff]  ;;  %154 = vmatprep.mubr.f32.mxu1 %v45_v26 }
  0x2e   :  { %214 = vmatpush3.bf16.msra.mxu0 %v213_v13  ;;  %248 = vmatpush3.bf16.msra.mxu1 %v213_v13  ;;  %v55_v30 = vld [vmem:[#allocation4 + $0x48] sm:$0xff]  ;;  %v227_v34 = vpack.c.bf16 %v73_v32, %v72_v31  ;;  %v56_v35 = vld [vmem:[#allocation4 + $0x50] sm:$0xff]  ;;  %v57_v36 = vld [vmem:[#allocation4 + $0x58] sm:$0xff] }
  0x2f   :  { %216 = vmatprep.subr.bf16.mxu0 %v215_v14  ;;  %241 = vmatprep.subr.bf16.mxu1 %v215_v14  ;;  %v225_v33 = vpack.c.bf16 %v55_v30, %v54_v29  ;;  %v74_v37 = vld [vmem:[#allocation4 + $0xe0] sm:$0xff]  ;;  %v75_v38 = vld [vmem:[#allocation4 + $0xe8] sm:$0xff]  ;;  %v229_v39 = vpack.c.bf16 %v57_v36, %v56_v35  ;;  %v76_v43 = vld [vmem:[#allocation4 + $0xf0] sm:$0xff] }
  0x30   :  { %149 = vmatprep.mubr.f32.mxu0 %v43_v25  ;;  %v231_v40 = vpack.c.bf16 %v75_v38, %v74_v37  ;;  %v58_v41 = vld [vmem:[#allocation4 + $0x60] sm:$0xff]  ;;  %v59_v42 = vld [vmem:[#allocation4 + $0x68] sm:$0xff]  ;;  %v77_v44 = vld [vmem:[#allocation4 + $0xf8] sm:$0xff] }
  0x31   :  { %v233_v45 = vpack.c.bf16 %v59_v42, %v58_v41  ;;  %v235_v46 = vpack.c.bf16 %v77_v44, %v76_v43  ;;  %v60_v47 = vld [vmem:[#allocation4 + $0x70] sm:$0xff]  ;;  %v61_v48 = vld [vmem:[#allocation4 + $0x78] sm:$0xff]  ;;  %v42_v50 = vld [vmem:[#allocation2] sm:$0xff] }
  0x32   :  { %218 = vmatpush3.bf16.msra.mxu0 %v217_v19  ;;  %249 = vmatpush3.bf16.msra.mxu1 %v217_v19  ;;  %v237_v49 = vpack.c.bf16 %v61_v48, %v60_v47  ;;  %v44_v51 = vld [vmem:[#allocation2 + $0x10] sm:$0xff] }
  0x33   :  { %220 = vmatprep.subr.bf16.mxu0 %v219_v20  ;;  %242 = vmatprep.subr.bf16.mxu1 %v219_v20  ;;  %v168_v54 = vld [vmem:[%s370_s2] ss:$0 sm:$0xff] }
  0x36   :  { %222 = vmatpush3.bf16.msra.mxu0 %v221_v27  ;;  %250 = vmatpush3.bf16.msra.mxu1 %v221_v27 }
  0x37   :  { %224 = vmatprep.subr.bf16.mxu0 %v223_v28  ;;  %243 = vmatprep.subr.bf16.mxu1 %v223_v28 }
  0x3a   :  { %226 = vmatpush3.bf16.msra.mxu0 %v225_v33  ;;  %251 = vmatpush3.bf16.msra.mxu1 %v225_v33 }
  0x3b   :  { %228 = vmatprep.subr.bf16.mxu0 %v227_v34  ;;  %244 = vmatprep.subr.bf16.mxu1 %v227_v34 }
  0x3e   :  { %230 = vmatpush3.bf16.msra.mxu0 %v229_v39  ;;  %252 = vmatpush3.bf16.msra.mxu1 %v229_v39 }
  0x3f   :  { %232 = vmatprep.subr.bf16.mxu0 %v231_v40  ;;  %245 = vmatprep.subr.bf16.mxu1 %v231_v40 }
  0x42   :  { %234 = vmatpush3.bf16.msra.mxu0 %v233_v45  ;;  %253 = vmatpush3.bf16.msra.mxu1 %v233_v45 }
  0x43   :  { %236 = vmatprep.subr.bf16.mxu0 %v235_v46  ;;  %246 = vmatprep.subr.bf16.mxu1 %v235_v46 }
  0x46   :  { %238 = vmatpush3.bf16.msra.mxu0 %v237_v49  ;;  %254 = vmatpush3.bf16.msra.mxu1 %v237_v49 }
  0x49   :  { %150 = vmatmul.mubr.f32.vlgmr.msra.gmra.mrb[0].mxu0 %v42_v50  ;;  %155 = vmatmul.mubr.f32.vlgmr.msra.gmra.mrb[0].mxu1 %v44_v51 }
 0x11c   :  { %v201_v52 = vpop.f32.mrb[0].mxu0  ;;  %v204_v53 = vpop.f32.mrb[0].mxu1 }
 0x11d   :  { %v202_v55 = vpop.f32.mrb[1].mxu0  ;;  %v205_v56 = vpop.f32.mrb[1].mxu1 }
 0x11e   :  { %v203_v57 = vadd.f32 %v202_v55, %v201_v52  ;;  %v206_v58 = vadd.f32 %v205_v56, %v204_v53 }
 0x120   :  { %v152_v59 = vadd.f32 %v203_v57, %v168_v54  ;;  %v157_v60 = vadd.f32 %v206_v58, %v168_v54 }
 0x122   :  { %160 = vst [vmem:[%s371_s3] sm:$0xff] %v152_v59  ;;  %161 = vst [vmem:[%s371_s3 + $0x8] sm:$0xff] %v157_v60 }
 0x123   :  { %166 = vsyncpa [#allocation3], 1 }
 0x124   :  { %167 = vsyncpa [#allocation5], 1 }

</bundles_post_ra>
